<compile_context>
chip_gen: v5e
topology: v5e:2x2
jax: 0.10.0
libtpu: 0.0.40
codegen_flags: <defaults>
</compile_context>

<pallas_src>
import functools

import jax
import jax.numpy as jnp
from jax import lax
from jax.experimental import pallas as pl
from jax.experimental.pallas import tpu as pltpu

_LANE = 128
_SUBLANE = 8
_TS_CAP = 32        # sublane rows per mode tile (keeps accumulator vreg pressure low)
_OC_CHUNK = 4       # output channels mixed per hoisted activation load
_UNROLL_CI = 8      # trace-time unroll threshold for the Ci reduction loop


def _cdiv(a, b):
    return -(-a // b)


def _round_up(a, b):
    return _cdiv(a, b) * b


def _largest_divisor(n, cap):
    cap = max(1, min(n, cap))
    for d in range(cap, 0, -1):
        if n % d == 0:
            return d
    return 1


def _shrink_divisor(n, cur):
    for d in range(cur - 1, 0, -1):
        if n % d == 0:
            return d
    return 1


def _vmem_params():
    """(double-buffered working-set budget, vmem_limit_bytes) per chip generation."""
    kind = ""
    try:
        kind = jax.devices()[0].device_kind.lower()
    except Exception:
        pass
    if ("v4" in kind or "v5" in kind or "v6" in kind) and "v7" not in kind:
        # 128 MiB physical VMEM: raise the scoped limit and let blocks grow.
        return 48 * 1024 * 1024, 100 * 1024 * 1024
    # v7x (64 MiB VMEM / TC) or unknown: stay conservative but set the limit explicitly.
    return 22 * 1024 * 1024, 48 * 1024 * 1024


def _choose_tiles(batch, ci, co, me, budget):
    """Pick (tb, tci, tco, ts, sp): divisor channel/batch tiles, dense (ts,128) mode tiles."""
    rows8 = _round_up(_cdiv(me, _LANE), _SUBLANE)
    tci = _largest_divisor(ci, 32)
    tco = _largest_divisor(co, 64)       # large tco -> n_co==1 avoids re-fetching v per Co tile
    tb = _largest_divisor(batch, 4)
    ts = min(rows8, _TS_CAP)

    def working_set(tb_, tci_, tco_, ts_):
        v = tb_ * tci_ * 2 * ts_ * _LANE * 4
        w = tci_ * 2 * tco_ * ts_ * _LANE * 4
        o = 2 * tb_ * tco_ * ts_ * _LANE * 4
        return 2 * (v + w + o)           # x2: double buffering

    # Back off until the double-buffered working set fits the budget
    # (ts first, then batch tile, then channel tiles -- the ts=8 floor alone
    #  is not assumed to be enough).
    while working_set(tb, tci, tco, ts) > budget:
        if ts > _SUBLANE:
            ts -= _SUBLANE
        elif tb > 1:
            tb = _shrink_divisor(batch, tb)
        elif tco > 1:
            tco = _shrink_divisor(co, tco)
        elif tci > 1:
            tci = _shrink_divisor(ci, tci)
        else:
            break

    # v7x has two TensorCores: make sure the parallel grid has extent >= 2
    # where possible (split batch first, then the mode axis, then Co).
    def par_extent(tb_, tco_, ts_):
        return (batch // tb_) * (co // tco_) * (_round_up(rows8, ts_) // ts_)

    if par_extent(tb, tco, ts) < 2:
        if batch >= 2:
            while batch // tb < 2 and tb > 1:
                tb = _shrink_divisor(batch, tb)
        elif ts >= 2 * _SUBLANE:
            ts = _round_up(ts // 2, _SUBLANE)
        elif co >= 2 and tco > 1:
            while co // tco < 2 and tco > 1:
                tco = _shrink_divisor(co, tco)

    sp = _round_up(rows8, ts)
    return tb, tci, tco, ts, sp


def _spectral_mix_kernel(v_ref, w_ref, o_ref, *, accumulate, oc_chunk, unroll_ci):
    """Per-mode complex channel mixing: out[b,o,m] (+)= sum_i v[b,i,m] * w[i,o,m].

      v_ref: (TB, TCi, 2, TS, 128)   activations, real/imag on axis 2
      w_ref: (TCi, 2, TCo, TS, 128)  weights
      o_ref: (2, TB, TCo, TS, 128)   output (resident across the Ci grid axis)

    Loop order is (b, o-chunk, i, o): v[b,i] is loaded once per reduction step
    (hoisted out of the o loop) and reused for `oc_chunk` outputs, so the vld
    slot stays well below the 8-VALU-op cost of each complex MAC (VALU-bound).
    """
    tb = v_ref.shape[0]
    tci = v_ref.shape[1]
    tco = w_ref.shape[2]

    is_first = (pl.program_id(3) == 0) if accumulate else None

    for b in range(tb):
        for o0 in range(0, tco, oc_chunk):
            n_o = min(oc_chunk, tco - o0)

            def term(i, b=b, o0=o0, n_o=n_o):
                vr = v_ref[b, i, 0]          # (TS,128) -- o-invariant load
                vi = v_ref[b, i, 1]
                outs = []
                for o in range(n_o):
                    wr = w_ref[i, 0, o0 + o]
                    wi = w_ref[i, 1, o0 + o]
                    outs.append(vr * wr - vi * wi)
                    outs.append(vr * wi + vi * wr)
                return tuple(outs)

            if tci <= unroll_ci:
                acc = term(0)
                for i in range(1, tci):
                    acc = tuple(a + t for a, t in zip(acc, term(i)))
            else:
                def body(i, carry, term=term):
                    return tuple(a + t for a, t in zip(carry, term(i)))
                acc = lax.fori_loop(1, tci, body, term(0), unroll=2)

            def store(add, b=b, o0=o0, n_o=n_o, acc=acc):
                for o in range(n_o):
                    if add:
                        o_ref[0, b, o0 + o] += acc[2 * o]
                        o_ref[1, b, o0 + o] += acc[2 * o + 1]
                    else:
                        o_ref[0, b, o0 + o] = acc[2 * o]
                        o_ref[1, b, o0 + o] = acc[2 * o + 1]

            if accumulate:
                # First Ci step writes directly (no zero-init pass, no RMW loads).
                @pl.when(is_first)
                def _():
                    store(False)

                @pl.when(jnp.logical_not(is_first))
                def _():
                    store(True)
            else:
                store(False)


def spectral_mix(v_packed, w_packed, tb, tci, tco, ts, vmem_limit):
    """v_packed: (B, Ci, 2, Sp, 128); w_packed: (Ci, 2, Co, Sp, 128)
    returns (2, B, Co, Sp, 128) float32."""
    batch, ci, _, sp, lane = v_packed.shape
    co = w_packed.shape[2]
    n_b, n_co, n_s, n_ci = batch // tb, co // tco, sp // ts, ci // tci

    kernel = functools.partial(
        _spectral_mix_kernel,
        accumulate=(n_ci > 1),
        oc_chunk=min(_OC_CHUNK, tco),
        unroll_ci=_UNROLL_CI,
    )
    return pl.pallas_call(
        kernel,
        grid=(n_b, n_co, n_s, n_ci),
        in_specs=[
            pl.BlockSpec((tb, tci, 2, ts, lane),
                         lambda b, c, s, k: (b, k, 0, s, 0)),
            pl.BlockSpec((tci, 2, tco, ts, lane),
                         lambda b, c, s, k: (k, 0, c, s, 0)),
        ],
        out_specs=pl.BlockSpec((2, tb, tco, ts, lane),
                               lambda b, c, s, k: (0, b, c, s, 0)),
        out_shape=jax.ShapeDtypeStruct((2, batch, co, sp, lane), jnp.float32),
        compiler_params=pltpu.CompilerParams(
            dimension_semantics=("parallel", "parallel", "parallel", "arbitrary"),
            vmem_limit_bytes=vmem_limit),
    )(v_packed, w_packed)


class SpectralConvS:
    """JAX/Pallas port of the PyTorch SpectralConvS module (bias=False path)."""

    def __init__(self, in_channels, out_channels, modes_x, modes_y, modes_t,
                 bias=False, delta=1.0, norm="backward", key=None):
        self.in_channels = in_channels
        self.out_channels = out_channels
        self.modes_x = modes_x
        self.modes_y = modes_y
        self.modes_t = modes_t
        self.delta = delta
        self.norm = norm
        if bias:
            # TODO(synk): bias path (delta * complex bias added per-corner) not implemented.
            raise NotImplementedError("bias=True path not implemented")
        gain = 0.5 / (in_channels * out_channels)
        key = jax.random.PRNGKey(0) if key is None else key
        # matches nn.ParameterList of 4 x (gain * torch.rand(Ci, Co, mx, my, mt, 2))
        self.weight = gain * jax.random.uniform(
            key,
            (4, in_channels, out_channels, modes_x, modes_y, modes_t, 2),
            dtype=jnp.float32,
        )
        # One-time weight pre-pack to the kernel layout (Ci, 2, Co, ME) where the
        # extended-mode index uses the NATURAL corner-gather ordering
        #   X = ix*mx + xi, Y = iy*my + yi, ext = (X*(2*my) + Y)*mt + ti
        # so the activations never need a corner-reordering transpose.
        # torch corner index c = ix + 2*iy.
        ci, co = in_channels, out_channels
        mx, my, mt = modes_x, modes_y, modes_t
        me = 4 * mx * my * mt
        w = jnp.transpose(self.weight, (1, 6, 2, 0, 3, 4, 5))     # (Ci,2,Co,4,mx,my,mt)
        w = w.reshape(ci, 2, co, 2, 2, mx, my, mt)                # corner -> (iy, ix)
        w = jnp.transpose(w, (0, 1, 2, 4, 5, 3, 6, 7))            # (Ci,2,Co,ix,mx,iy,my,mt)
        self._w_ext = w.reshape(ci, 2, co, me)
        self._me = me

    def __call__(self, v):
        batch, ci, nx, ny, nt = v.shape
        assert ci == self.in_channels
        co = self.out_channels
        nt_half = nt // 2 + 1
        mx, my, mt = self.modes_x, self.modes_y, self.modes_t
        assert 2 * mx <= nx and 2 * my <= ny and mt <= nt_half
        me = self._me

        v_hat = jnp.fft.rfftn(v, axes=(-3, -2, -1), norm=self.norm)  # (B,Ci,nx,ny,nth) c64

        # ---- gather the 4 retained-mode corners (natural ordering, no transpose) ----
        vx = jnp.concatenate([v_hat[:, :, :mx], v_hat[:, :, nx - mx:]], axis=2)
        vxy = jnp.concatenate([vx[:, :, :, :my], vx[:, :, :, ny - my:]], axis=3)
        vc = vxy[..., :mt].reshape(batch, ci, me)                    # (B,Ci,ME)

        # ---- choose tiles & pad to dense (Sp, 128) mode layout ----
        budget, vmem_limit = _vmem_params()
        tb, tci, tco, ts, sp = _choose_tiles(batch, ci, co, me, budget)
        mp = sp * _LANE

        v_ri = jnp.stack([jnp.real(vc), jnp.imag(vc)], axis=2).astype(jnp.float32)  # (B,Ci,2,ME)
        v_ri = jnp.pad(v_ri, ((0, 0), (0, 0), (0, 0), (0, mp - me)))
        v_packed = v_ri.reshape(batch, ci, 2, sp, _LANE)

        w = jnp.pad(self._w_ext, ((0, 0), (0, 0), (0, 0), (0, mp - me)))
        w_packed = w.reshape(ci, 2, co, sp, _LANE)

        # ---- Pallas kernel: complex per-mode channel mixing ----
        out_packed = spectral_mix(v_packed, w_packed, tb, tci, tco, ts, vmem_limit)

        # ---- unpack, scatter back into the full spectrum, inverse FFT ----
        out = out_packed.reshape(2, batch, co, mp)[..., :me]
        out_c = lax.complex(out[0], out[1]).reshape(batch, co, 2 * mx, 2 * my, mt)

        zx = jnp.zeros((batch, co, nx - 2 * mx, 2 * my, mt), out_c.dtype)
        fx = jnp.concatenate([out_c[:, :, :mx], zx, out_c[:, :, mx:]], axis=2)  # (B,Co,nx,2my,mt)
        zy = jnp.zeros((batch, co, nx, ny - 2 * my, mt), out_c.dtype)
        fy = jnp.concatenate([fx[:, :, :, :my], zy, fx[:, :, :, my:]], axis=3)  # (B,Co,nx,ny,mt)
        out_hat = jnp.pad(fy, ((0, 0), (0, 0), (0, 0), (0, 0), (0, nt_half - mt)))

        return jnp.fft.irfftn(out_hat, s=(nx, ny, nt), axes=(-3, -2, -1), norm=self.norm)

    # pure-jnp reference (no Pallas), used for a correctness check
    def reference(self, v):
        batch, ci, nx, ny, nt = v.shape
        nt_half = nt // 2 + 1
        mx, my, mt = self.modes_x, self.modes_y, self.modes_t
        v_hat = jnp.fft.rfftn(v, axes=(-3, -2, -1), norm=self.norm)
        w_c = lax.complex(self.weight[..., 0], self.weight[..., 1])
        sx = [slice(0, mx), slice(nx - mx, nx)]
        sy = [slice(0, my), slice(ny - my, ny)]
        out_hat = jnp.zeros((batch, self.out_channels, nx, ny, nt_half), dtype=v_hat.dtype)
        for c in range(4):
            ix, iy = c % 2, c // 2
            blk = jnp.einsum("bixyz,ioxyz->boxyz",
                             v_hat[:, :, sx[ix], sy[iy], 0:mt], w_c[c])
            out_hat = out_hat.at[:, :, sx[ix], sy[iy], 0:mt].set(blk)
        return jnp.fft.irfftn(out_hat, s=(nx, ny, nt), axes=(-3, -2, -1), norm=self.norm)


if __name__ == "__main__":
    B, Cin, Cout = 2, 4, 4
    nx, ny, nt = 16, 16, 8
    modes_x, modes_y, modes_t = 4, 4, 3

    key = jax.random.PRNGKey(0)
    k_x, k_w = jax.random.split(key)
    x = jax.random.normal(k_x, (B, Cin, nx, ny, nt), dtype=jnp.float32)

    mod = SpectralConvS(Cin, Cout, modes_x, modes_y, modes_t, key=k_w)

    out = jax.block_until_ready(mod(x))
    ref = jax.block_until_ready(mod.reference(x))

    assert out.shape == (B, Cout, nx, ny, nt)
    assert jnp.allclose(out, ref, atol=1e-5, rtol=1e-4), "mismatch vs jnp reference"

    print("KERNEL_OK")
</pallas_src>

<mosaic_0001>
module attributes {stable_mosaic.version = 11 : i64} {
  func.func @_spectral_mix_kernel(%arg0: i32, %arg1: i32, %arg2: i32, %arg3: i32, %arg4: memref<1x4x2x8x128xf32, #tpu.memory_space<vmem>>, %arg5: memref<4x2x4x8x128xf32, #tpu.memory_space<vmem>>, %arg6: memref<2x1x4x8x128xf32, #tpu.memory_space<vmem>>) attributes {dimension_semantics = [#tpu.dimension_semantics<parallel>, #tpu.dimension_semantics<parallel>, #tpu.dimension_semantics<parallel>, #tpu.dimension_semantics<arbitrary>], iteration_bounds = array<i64: 2, 1, 1, 1>, scalar_prefetch = 0 : i64, scratch_operands = 0 : i64, tpu.core_type = #tpu.core_type<tc>, window_params = [{transform_indices = @transform_0, window_bounds = array<i64: 1, 4, 2, 8, 128>}, {transform_indices = @transform_1, window_bounds = array<i64: 4, 2, 4, 8, 128>}, {transform_indices = @transform_2, window_bounds = array<i64: 2, 1, 4, 8, 128>}]} {
    %c0 = arith.constant 0 : index
    %c0_0 = arith.constant 0 : index
    %c0_1 = arith.constant 0 : index
    %c0_2 = arith.constant 0 : index
    %c0_3 = arith.constant 0 : index
    %0 = vector.load %arg4[%c0, %c0_0, %c0_1, %c0_2, %c0_3] : memref<1x4x2x8x128xf32, #tpu.memory_space<vmem>>, vector<1x1x1x8x128xf32>
    %1 = vector.shape_cast %0 : vector<1x1x1x8x128xf32> to vector<8x128xf32>
    %c0_4 = arith.constant 0 : index
    %c0_5 = arith.constant 0 : index
    %c1 = arith.constant 1 : index
    %c0_6 = arith.constant 0 : index
    %c0_7 = arith.constant 0 : index
    %2 = vector.load %arg4[%c0_4, %c0_5, %c1, %c0_6, %c0_7] : memref<1x4x2x8x128xf32, #tpu.memory_space<vmem>>, vector<1x1x1x8x128xf32>
    %3 = vector.shape_cast %2 : vector<1x1x1x8x128xf32> to vector<8x128xf32>
    %c0_8 = arith.constant 0 : index
    %c0_9 = arith.constant 0 : index
    %c0_10 = arith.constant 0 : index
    %c0_11 = arith.constant 0 : index
    %c0_12 = arith.constant 0 : index
    %4 = vector.load %arg5[%c0_8, %c0_9, %c0_10, %c0_11, %c0_12] : memref<4x2x4x8x128xf32, #tpu.memory_space<vmem>>, vector<1x1x1x8x128xf32>
    %5 = vector.shape_cast %4 : vector<1x1x1x8x128xf32> to vector<8x128xf32>
    %c0_13 = arith.constant 0 : index
    %c1_14 = arith.constant 1 : index
    %c0_15 = arith.constant 0 : index
    %c0_16 = arith.constant 0 : index
    %c0_17 = arith.constant 0 : index
    %6 = vector.load %arg5[%c0_13, %c1_14, %c0_15, %c0_16, %c0_17] : memref<4x2x4x8x128xf32, #tpu.memory_space<vmem>>, vector<1x1x1x8x128xf32>
    %7 = vector.shape_cast %6 : vector<1x1x1x8x128xf32> to vector<8x128xf32>
    %8 = arith.mulf %1, %5 : vector<8x128xf32>
    %9 = arith.mulf %3, %7 : vector<8x128xf32>
    %10 = arith.subf %8, %9 : vector<8x128xf32>
    %11 = arith.mulf %1, %7 : vector<8x128xf32>
    %12 = arith.mulf %3, %5 : vector<8x128xf32>
    %13 = arith.addf %11, %12 : vector<8x128xf32>
    %c0_18 = arith.constant 0 : index
    %c0_19 = arith.constant 0 : index
    %c1_20 = arith.constant 1 : index
    %c0_21 = arith.constant 0 : index
    %c0_22 = arith.constant 0 : index
    %14 = vector.load %arg5[%c0_18, %c0_19, %c1_20, %c0_21, %c0_22] : memref<4x2x4x8x128xf32, #tpu.memory_space<vmem>>, vector<1x1x1x8x128xf32>
    %15 = vector.shape_cast %14 : vector<1x1x1x8x128xf32> to vector<8x128xf32>
    %c0_23 = arith.constant 0 : index
    %c1_24 = arith.constant 1 : index
    %c1_25 = arith.constant 1 : index
    %c0_26 = arith.constant 0 : index
    %c0_27 = arith.constant 0 : index
    %16 = vector.load %arg5[%c0_23, %c1_24, %c1_25, %c0_26, %c0_27] : memref<4x2x4x8x128xf32, #tpu.memory_space<vmem>>, vector<1x1x1x8x128xf32>
    %17 = vector.shape_cast %16 : vector<1x1x1x8x128xf32> to vector<8x128xf32>
    %18 = arith.mulf %1, %15 : vector<8x128xf32>
    %19 = arith.mulf %3, %17 : vector<8x128xf32>
    %20 = arith.subf %18, %19 : vector<8x128xf32>
    %21 = arith.mulf %1, %17 : vector<8x128xf32>
    %22 = arith.mulf %3, %15 : vector<8x128xf32>
    %23 = arith.addf %21, %22 : vector<8x128xf32>
    %c0_28 = arith.constant 0 : index
    %c0_29 = arith.constant 0 : index
    %c2 = arith.constant 2 : index
    %c0_30 = arith.constant 0 : index
    %c0_31 = arith.constant 0 : index
    %24 = vector.load %arg5[%c0_28, %c0_29, %c2, %c0_30, %c0_31] : memref<4x2x4x8x128xf32, #tpu.memory_space<vmem>>, vector<1x1x1x8x128xf32>
    %25 = vector.shape_cast %24 : vector<1x1x1x8x128xf32> to vector<8x128xf32>
    %c0_32 = arith.constant 0 : index
    %c1_33 = arith.constant 1 : index
    %c2_34 = arith.constant 2 : index
    %c0_35 = arith.constant 0 : index
    %c0_36 = arith.constant 0 : index
    %26 = vector.load %arg5[%c0_32, %c1_33, %c2_34, %c0_35, %c0_36] : memref<4x2x4x8x128xf32, #tpu.memory_space<vmem>>, vector<1x1x1x8x128xf32>
    %27 = vector.shape_cast %26 : vector<1x1x1x8x128xf32> to vector<8x128xf32>
    %28 = arith.mulf %1, %25 : vector<8x128xf32>
    %29 = arith.mulf %3, %27 : vector<8x128xf32>
    %30 = arith.subf %28, %29 : vector<8x128xf32>
    %31 = arith.mulf %1, %27 : vector<8x128xf32>
    %32 = arith.mulf %3, %25 : vector<8x128xf32>
    %33 = arith.addf %31, %32 : vector<8x128xf32>
    %c0_37 = arith.constant 0 : index
    %c0_38 = arith.constant 0 : index
    %c3 = arith.constant 3 : index
    %c0_39 = arith.constant 0 : index
    %c0_40 = arith.constant 0 : index
    %34 = vector.load %arg5[%c0_37, %c0_38, %c3, %c0_39, %c0_40] : memref<4x2x4x8x128xf32, #tpu.memory_space<vmem>>, vector<1x1x1x8x128xf32>
    %35 = vector.shape_cast %34 : vector<1x1x1x8x128xf32> to vector<8x128xf32>
    %c0_41 = arith.constant 0 : index
    %c1_42 = arith.constant 1 : index
    %c3_43 = arith.constant 3 : index
    %c0_44 = arith.constant 0 : index
    %c0_45 = arith.constant 0 : index
    %36 = vector.load %arg5[%c0_41, %c1_42, %c3_43, %c0_44, %c0_45] : memref<4x2x4x8x128xf32, #tpu.memory_space<vmem>>, vector<1x1x1x8x128xf32>
    %37 = vector.shape_cast %36 : vector<1x1x1x8x128xf32> to vector<8x128xf32>
    %38 = arith.mulf %1, %35 : vector<8x128xf32>
    %39 = arith.mulf %3, %37 : vector<8x128xf32>
    %40 = arith.subf %38, %39 : vector<8x128xf32>
    %41 = arith.mulf %1, %37 : vector<8x128xf32>
    %42 = arith.mulf %3, %35 : vector<8x128xf32>
    %43 = arith.addf %41, %42 : vector<8x128xf32>
    %c0_46 = arith.constant 0 : index
    %c1_47 = arith.constant 1 : index
    %c0_48 = arith.constant 0 : index
    %c0_49 = arith.constant 0 : index
    %c0_50 = arith.constant 0 : index
    %44 = vector.load %arg4[%c0_46, %c1_47, %c0_48, %c0_49, %c0_50] : memref<1x4x2x8x128xf32, #tpu.memory_space<vmem>>, vector<1x1x1x8x128xf32>
    %45 = vector.shape_cast %44 : vector<1x1x1x8x128xf32> to vector<8x128xf32>
    %c0_51 = arith.constant 0 : index
    %c1_52 = arith.constant 1 : index
    %c1_53 = arith.constant 1 : index
    %c0_54 = arith.constant 0 : index
    %c0_55 = arith.constant 0 : index
    %46 = vector.load %arg4[%c0_51, %c1_52, %c1_53, %c0_54, %c0_55] : memref<1x4x2x8x128xf32, #tpu.memory_space<vmem>>, vector<1x1x1x8x128xf32>
    %47 = vector.shape_cast %46 : vector<1x1x1x8x128xf32> to vector<8x128xf32>
    %c1_56 = arith.constant 1 : index
    %c0_57 = arith.constant 0 : index
    %c0_58 = arith.constant 0 : index
    %c0_59 = arith.constant 0 : index
    %c0_60 = arith.constant 0 : index
    %48 = vector.load %arg5[%c1_56, %c0_57, %c0_58, %c0_59, %c0_60] : memref<4x2x4x8x128xf32, #tpu.memory_space<vmem>>, vector<1x1x1x8x128xf32>
    %49 = vector.shape_cast %48 : vector<1x1x1x8x128xf32> to vector<8x128xf32>
    %c1_61 = arith.constant 1 : index
    %c1_62 = arith.constant 1 : index
    %c0_63 = arith.constant 0 : index
    %c0_64 = arith.constant 0 : index
    %c0_65 = arith.constant 0 : index
    %50 = vector.load %arg5[%c1_61, %c1_62, %c0_63, %c0_64, %c0_65] : memref<4x2x4x8x128xf32, #tpu.memory_space<vmem>>, vector<1x1x1x8x128xf32>
    %51 = vector.shape_cast %50 : vector<1x1x1x8x128xf32> to vector<8x128xf32>
    %52 = arith.mulf %45, %49 : vector<8x128xf32>
    %53 = arith.mulf %47, %51 : vector<8x128xf32>
    %54 = arith.subf %52, %53 : vector<8x128xf32>
    %55 = arith.mulf %45, %51 : vector<8x128xf32>
    %56 = arith.mulf %47, %49 : vector<8x128xf32>
    %57 = arith.addf %55, %56 : vector<8x128xf32>
    %c1_66 = arith.constant 1 : index
    %c0_67 = arith.constant 0 : index
    %c1_68 = arith.constant 1 : index
    %c0_69 = arith.constant 0 : index
    %c0_70 = arith.constant 0 : index
    %58 = vector.load %arg5[%c1_66, %c0_67, %c1_68, %c0_69, %c0_70] : memref<4x2x4x8x128xf32, #tpu.memory_space<vmem>>, vector<1x1x1x8x128xf32>
    %59 = vector.shape_cast %58 : vector<1x1x1x8x128xf32> to vector<8x128xf32>
    %c1_71 = arith.constant 1 : index
    %c1_72 = arith.constant 1 : index
    %c1_73 = arith.constant 1 : index
    %c0_74 = arith.constant 0 : index
    %c0_75 = arith.constant 0 : index
    %60 = vector.load %arg5[%c1_71, %c1_72, %c1_73, %c0_74, %c0_75] : memref<4x2x4x8x128xf32, #tpu.memory_space<vmem>>, vector<1x1x1x8x128xf32>
    %61 = vector.shape_cast %60 : vector<1x1x1x8x128xf32> to vector<8x128xf32>
    %62 = arith.mulf %45, %59 : vector<8x128xf32>
    %63 = arith.mulf %47, %61 : vector<8x128xf32>
    %64 = arith.subf %62, %63 : vector<8x128xf32>
    %65 = arith.mulf %45, %61 : vector<8x128xf32>
    %66 = arith.mulf %47, %59 : vector<8x128xf32>
    %67 = arith.addf %65, %66 : vector<8x128xf32>
    %c1_76 = arith.constant 1 : index
    %c0_77 = arith.constant 0 : index
    %c2_78 = arith.constant 2 : index
    %c0_79 = arith.constant 0 : index
    %c0_80 = arith.constant 0 : index
    %68 = vector.load %arg5[%c1_76, %c0_77, %c2_78, %c0_79, %c0_80] : memref<4x2x4x8x128xf32, #tpu.memory_space<vmem>>, vector<1x1x1x8x128xf32>
    %69 = vector.shape_cast %68 : vector<1x1x1x8x128xf32> to vector<8x128xf32>
    %c1_81 = arith.constant 1 : index
    %c1_82 = arith.constant 1 : index
    %c2_83 = arith.constant 2 : index
    %c0_84 = arith.constant 0 : index
    %c0_85 = arith.constant 0 : index
    %70 = vector.load %arg5[%c1_81, %c1_82, %c2_83, %c0_84, %c0_85] : memref<4x2x4x8x128xf32, #tpu.memory_space<vmem>>, vector<1x1x1x8x128xf32>
    %71 = vector.shape_cast %70 : vector<1x1x1x8x128xf32> to vector<8x128xf32>
    %72 = arith.mulf %45, %69 : vector<8x128xf32>
    %73 = arith.mulf %47, %71 : vector<8x128xf32>
    %74 = arith.subf %72, %73 : vector<8x128xf32>
    %75 = arith.mulf %45, %71 : vector<8x128xf32>
    %76 = arith.mulf %47, %69 : vector<8x128xf32>
    %77 = arith.addf %75, %76 : vector<8x128xf32>
    %c1_86 = arith.constant 1 : index
    %c0_87 = arith.constant 0 : index
    %c3_88 = arith.constant 3 : index
    %c0_89 = arith.constant 0 : index
    %c0_90 = arith.constant 0 : index
    %78 = vector.load %arg5[%c1_86, %c0_87, %c3_88, %c0_89, %c0_90] : memref<4x2x4x8x128xf32, #tpu.memory_space<vmem>>, vector<1x1x1x8x128xf32>
    %79 = vector.shape_cast %78 : vector<1x1x1x8x128xf32> to vector<8x128xf32>
    %c1_91 = arith.constant 1 : index
    %c1_92 = arith.constant 1 : index
    %c3_93 = arith.constant 3 : index
    %c0_94 = arith.constant 0 : index
    %c0_95 = arith.constant 0 : index
    %80 = vector.load %arg5[%c1_91, %c1_92, %c3_93, %c0_94, %c0_95] : memref<4x2x4x8x128xf32, #tpu.memory_space<vmem>>, vector<1x1x1x8x128xf32>
    %81 = vector.shape_cast %80 : vector<1x1x1x8x128xf32> to vector<8x128xf32>
    %82 = arith.mulf %45, %79 : vector<8x128xf32>
    %83 = arith.mulf %47, %81 : vector<8x128xf32>
    %84 = arith.subf %82, %83 : vector<8x128xf32>
    %85 = arith.mulf %45, %81 : vector<8x128xf32>
    %86 = arith.mulf %47, %79 : vector<8x128xf32>
    %87 = arith.addf %85, %86 : vector<8x128xf32>
    %88 = arith.addf %10, %54 : vector<8x128xf32>
    %89 = arith.addf %13, %57 : vector<8x128xf32>
    %90 = arith.addf %20, %64 : vector<8x128xf32>
    %91 = arith.addf %23, %67 : vector<8x128xf32>
    %92 = arith.addf %30, %74 : vector<8x128xf32>
    %93 = arith.addf %33, %77 : vector<8x128xf32>
    %94 = arith.addf %40, %84 : vector<8x128xf32>
    %95 = arith.addf %43, %87 : vector<8x128xf32>
    %c0_96 = arith.constant 0 : index
    %c2_97 = arith.constant 2 : index
    %c0_98 = arith.constant 0 : index
    %c0_99 = arith.constant 0 : index
    %c0_100 = arith.constant 0 : index
    %96 = vector.load %arg4[%c0_96, %c2_97, %c0_98, %c0_99, %c0_100] : memref<1x4x2x8x128xf32, #tpu.memory_space<vmem>>, vector<1x1x1x8x128xf32>
    %97 = vector.shape_cast %96 : vector<1x1x1x8x128xf32> to vector<8x128xf32>
    %c0_101 = arith.constant 0 : index
    %c2_102 = arith.constant 2 : index
    %c1_103 = arith.constant 1 : index
    %c0_104 = arith.constant 0 : index
    %c0_105 = arith.constant 0 : index
    %98 = vector.load %arg4[%c0_101, %c2_102, %c1_103, %c0_104, %c0_105] : memref<1x4x2x8x128xf32, #tpu.memory_space<vmem>>, vector<1x1x1x8x128xf32>
    %99 = vector.shape_cast %98 : vector<1x1x1x8x128xf32> to vector<8x128xf32>
    %c2_106 = arith.constant 2 : index
    %c0_107 = arith.constant 0 : index
    %c0_108 = arith.constant 0 : index
    %c0_109 = arith.constant 0 : index
    %c0_110 = arith.constant 0 : index
    %100 = vector.load %arg5[%c2_106, %c0_107, %c0_108, %c0_109, %c0_110] : memref<4x2x4x8x128xf32, #tpu.memory_space<vmem>>, vector<1x1x1x8x128xf32>
    %101 = vector.shape_cast %100 : vector<1x1x1x8x128xf32> to vector<8x128xf32>
    %c2_111 = arith.constant 2 : index
    %c1_112 = arith.constant 1 : index
    %c0_113 = arith.constant 0 : index
    %c0_114 = arith.constant 0 : index
    %c0_115 = arith.constant 0 : index
    %102 = vector.load %arg5[%c2_111, %c1_112, %c0_113, %c0_114, %c0_115] : memref<4x2x4x8x128xf32, #tpu.memory_space<vmem>>, vector<1x1x1x8x128xf32>
    %103 = vector.shape_cast %102 : vector<1x1x1x8x128xf32> to vector<8x128xf32>
    %104 = arith.mulf %97, %101 : vector<8x128xf32>
    %105 = arith.mulf %99, %103 : vector<8x128xf32>
    %106 = arith.subf %104, %105 : vector<8x128xf32>
    %107 = arith.mulf %97, %103 : vector<8x128xf32>
    %108 = arith.mulf %99, %101 : vector<8x128xf32>
    %109 = arith.addf %107, %108 : vector<8x128xf32>
    %c2_116 = arith.constant 2 : index
    %c0_117 = arith.constant 0 : index
    %c1_118 = arith.constant 1 : index
    %c0_119 = arith.constant 0 : index
    %c0_120 = arith.constant 0 : index
    %110 = vector.load %arg5[%c2_116, %c0_117, %c1_118, %c0_119, %c0_120] : memref<4x2x4x8x128xf32, #tpu.memory_space<vmem>>, vector<1x1x1x8x128xf32>
    %111 = vector.shape_cast %110 : vector<1x1x1x8x128xf32> to vector<8x128xf32>
    %c2_121 = arith.constant 2 : index
    %c1_122 = arith.constant 1 : index
    %c1_123 = arith.constant 1 : index
    %c0_124 = arith.constant 0 : index
    %c0_125 = arith.constant 0 : index
    %112 = vector.load %arg5[%c2_121, %c1_122, %c1_123, %c0_124, %c0_125] : memref<4x2x4x8x128xf32, #tpu.memory_space<vmem>>, vector<1x1x1x8x128xf32>
    %113 = vector.shape_cast %112 : vector<1x1x1x8x128xf32> to vector<8x128xf32>
    %114 = arith.mulf %97, %111 : vector<8x128xf32>
    %115 = arith.mulf %99, %113 : vector<8x128xf32>
    %116 = arith.subf %114, %115 : vector<8x128xf32>
    %117 = arith.mulf %97, %113 : vector<8x128xf32>
    %118 = arith.mulf %99, %111 : vector<8x128xf32>
    %119 = arith.addf %117, %118 : vector<8x128xf32>
    %c2_126 = arith.constant 2 : index
    %c0_127 = arith.constant 0 : index
    %c2_128 = arith.constant 2 : index
    %c0_129 = arith.constant 0 : index
    %c0_130 = arith.constant 0 : index
    %120 = vector.load %arg5[%c2_126, %c0_127, %c2_128, %c0_129, %c0_130] : memref<4x2x4x8x128xf32, #tpu.memory_space<vmem>>, vector<1x1x1x8x128xf32>
    %121 = vector.shape_cast %120 : vector<1x1x1x8x128xf32> to vector<8x128xf32>
    %c2_131 = arith.constant 2 : index
    %c1_132 = arith.constant 1 : index
    %c2_133 = arith.constant 2 : index
    %c0_134 = arith.constant 0 : index
    %c0_135 = arith.constant 0 : index
    %122 = vector.load %arg5[%c2_131, %c1_132, %c2_133, %c0_134, %c0_135] : memref<4x2x4x8x128xf32, #tpu.memory_space<vmem>>, vector<1x1x1x8x128xf32>
    %123 = vector.shape_cast %122 : vector<1x1x1x8x128xf32> to vector<8x128xf32>
    %124 = arith.mulf %97, %121 : vector<8x128xf32>
    %125 = arith.mulf %99, %123 : vector<8x128xf32>
    %126 = arith.subf %124, %125 : vector<8x128xf32>
    %127 = arith.mulf %97, %123 : vector<8x128xf32>
    %128 = arith.mulf %99, %121 : vector<8x128xf32>
    %129 = arith.addf %127, %128 : vector<8x128xf32>
    %c2_136 = arith.constant 2 : index
    %c0_137 = arith.constant 0 : index
    %c3_138 = arith.constant 3 : index
    %c0_139 = arith.constant 0 : index
    %c0_140 = arith.constant 0 : index
    %130 = vector.load %arg5[%c2_136, %c0_137, %c3_138, %c0_139, %c0_140] : memref<4x2x4x8x128xf32, #tpu.memory_space<vmem>>, vector<1x1x1x8x128xf32>
    %131 = vector.shape_cast %130 : vector<1x1x1x8x128xf32> to vector<8x128xf32>
    %c2_141 = arith.constant 2 : index
    %c1_142 = arith.constant 1 : index
    %c3_143 = arith.constant 3 : index
    %c0_144 = arith.constant 0 : index
    %c0_145 = arith.constant 0 : index
    %132 = vector.load %arg5[%c2_141, %c1_142, %c3_143, %c0_144, %c0_145] : memref<4x2x4x8x128xf32, #tpu.memory_space<vmem>>, vector<1x1x1x8x128xf32>
    %133 = vector.shape_cast %132 : vector<1x1x1x8x128xf32> to vector<8x128xf32>
    %134 = arith.mulf %97, %131 : vector<8x128xf32>
    %135 = arith.mulf %99, %133 : vector<8x128xf32>
    %136 = arith.subf %134, %135 : vector<8x128xf32>
    %137 = arith.mulf %97, %133 : vector<8x128xf32>
    %138 = arith.mulf %99, %131 : vector<8x128xf32>
    %139 = arith.addf %137, %138 : vector<8x128xf32>
    %140 = arith.addf %88, %106 : vector<8x128xf32>
    %141 = arith.addf %89, %109 : vector<8x128xf32>
    %142 = arith.addf %90, %116 : vector<8x128xf32>
    %143 = arith.addf %91, %119 : vector<8x128xf32>
    %144 = arith.addf %92, %126 : vector<8x128xf32>
    %145 = arith.addf %93, %129 : vector<8x128xf32>
    %146 = arith.addf %94, %136 : vector<8x128xf32>
    %147 = arith.addf %95, %139 : vector<8x128xf32>
    %c0_146 = arith.constant 0 : index
    %c3_147 = arith.constant 3 : index
    %c0_148 = arith.constant 0 : index
    %c0_149 = arith.constant 0 : index
    %c0_150 = arith.constant 0 : index
    %148 = vector.load %arg4[%c0_146, %c3_147, %c0_148, %c0_149, %c0_150] : memref<1x4x2x8x128xf32, #tpu.memory_space<vmem>>, vector<1x1x1x8x128xf32>
    %149 = vector.shape_cast %148 : vector<1x1x1x8x128xf32> to vector<8x128xf32>
    %c0_151 = arith.constant 0 : index
    %c3_152 = arith.constant 3 : index
    %c1_153 = arith.constant 1 : index
    %c0_154 = arith.constant 0 : index
    %c0_155 = arith.constant 0 : index
    %150 = vector.load %arg4[%c0_151, %c3_152, %c1_153, %c0_154, %c0_155] : memref<1x4x2x8x128xf32, #tpu.memory_space<vmem>>, vector<1x1x1x8x128xf32>
    %151 = vector.shape_cast %150 : vector<1x1x1x8x128xf32> to vector<8x128xf32>
    %c3_156 = arith.constant 3 : index
    %c0_157 = arith.constant 0 : index
    %c0_158 = arith.constant 0 : index
    %c0_159 = arith.constant 0 : index
    %c0_160 = arith.constant 0 : index
    %152 = vector.load %arg5[%c3_156, %c0_157, %c0_158, %c0_159, %c0_160] : memref<4x2x4x8x128xf32, #tpu.memory_space<vmem>>, vector<1x1x1x8x128xf32>
    %153 = vector.shape_cast %152 : vector<1x1x1x8x128xf32> to vector<8x128xf32>
    %c3_161 = arith.constant 3 : index
    %c1_162 = arith.constant 1 : index
    %c0_163 = arith.constant 0 : index
    %c0_164 = arith.constant 0 : index
    %c0_165 = arith.constant 0 : index
    %154 = vector.load %arg5[%c3_161, %c1_162, %c0_163, %c0_164, %c0_165] : memref<4x2x4x8x128xf32, #tpu.memory_space<vmem>>, vector<1x1x1x8x128xf32>
    %155 = vector.shape_cast %154 : vector<1x1x1x8x128xf32> to vector<8x128xf32>
    %156 = arith.mulf %149, %153 : vector<8x128xf32>
    %157 = arith.mulf %151, %155 : vector<8x128xf32>
    %158 = arith.subf %156, %157 : vector<8x128xf32>
    %159 = arith.mulf %149, %155 : vector<8x128xf32>
    %160 = arith.mulf %151, %153 : vector<8x128xf32>
    %161 = arith.addf %159, %160 : vector<8x128xf32>
    %c3_166 = arith.constant 3 : index
    %c0_167 = arith.constant 0 : index
    %c1_168 = arith.constant 1 : index
    %c0_169 = arith.constant 0 : index
    %c0_170 = arith.constant 0 : index
    %162 = vector.load %arg5[%c3_166, %c0_167, %c1_168, %c0_169, %c0_170] : memref<4x2x4x8x128xf32, #tpu.memory_space<vmem>>, vector<1x1x1x8x128xf32>
    %163 = vector.shape_cast %162 : vector<1x1x1x8x128xf32> to vector<8x128xf32>
    %c3_171 = arith.constant 3 : index
    %c1_172 = arith.constant 1 : index
    %c1_173 = arith.constant 1 : index
    %c0_174 = arith.constant 0 : index
    %c0_175 = arith.constant 0 : index
    %164 = vector.load %arg5[%c3_171, %c1_172, %c1_173, %c0_174, %c0_175] : memref<4x2x4x8x128xf32, #tpu.memory_space<vmem>>, vector<1x1x1x8x128xf32>
    %165 = vector.shape_cast %164 : vector<1x1x1x8x128xf32> to vector<8x128xf32>
    %166 = arith.mulf %149, %163 : vector<8x128xf32>
    %167 = arith.mulf %151, %165 : vector<8x128xf32>
    %168 = arith.subf %166, %167 : vector<8x128xf32>
    %169 = arith.mulf %149, %165 : vector<8x128xf32>
    %170 = arith.mulf %151, %163 : vector<8x128xf32>
    %171 = arith.addf %169, %170 : vector<8x128xf32>
    %c3_176 = arith.constant 3 : index
    %c0_177 = arith.constant 0 : index
    %c2_178 = arith.constant 2 : index
    %c0_179 = arith.constant 0 : index
    %c0_180 = arith.constant 0 : index
    %172 = vector.load %arg5[%c3_176, %c0_177, %c2_178, %c0_179, %c0_180] : memref<4x2x4x8x128xf32, #tpu.memory_space<vmem>>, vector<1x1x1x8x128xf32>
    %173 = vector.shape_cast %172 : vector<1x1x1x8x128xf32> to vector<8x128xf32>
    %c3_181 = arith.constant 3 : index
    %c1_182 = arith.constant 1 : index
    %c2_183 = arith.constant 2 : index
    %c0_184 = arith.constant 0 : index
    %c0_185 = arith.constant 0 : index
    %174 = vector.load %arg5[%c3_181, %c1_182, %c2_183, %c0_184, %c0_185] : memref<4x2x4x8x128xf32, #tpu.memory_space<vmem>>, vector<1x1x1x8x128xf32>
    %175 = vector.shape_cast %174 : vector<1x1x1x8x128xf32> to vector<8x128xf32>
    %176 = arith.mulf %149, %173 : vector<8x128xf32>
    %177 = arith.mulf %151, %175 : vector<8x128xf32>
    %178 = arith.subf %176, %177 : vector<8x128xf32>
    %179 = arith.mulf %149, %175 : vector<8x128xf32>
    %180 = arith.mulf %151, %173 : vector<8x128xf32>
    %181 = arith.addf %179, %180 : vector<8x128xf32>
    %c3_186 = arith.constant 3 : index
    %c0_187 = arith.constant 0 : index
    %c3_188 = arith.constant 3 : index
    %c0_189 = arith.constant 0 : index
    %c0_190 = arith.constant 0 : index
    %182 = vector.load %arg5[%c3_186, %c0_187, %c3_188, %c0_189, %c0_190] : memref<4x2x4x8x128xf32, #tpu.memory_space<vmem>>, vector<1x1x1x8x128xf32>
    %183 = vector.shape_cast %182 : vector<1x1x1x8x128xf32> to vector<8x128xf32>
    %c3_191 = arith.constant 3 : index
    %c1_192 = arith.constant 1 : index
    %c3_193 = arith.constant 3 : index
    %c0_194 = arith.constant 0 : index
    %c0_195 = arith.constant 0 : index
    %184 = vector.load %arg5[%c3_191, %c1_192, %c3_193, %c0_194, %c0_195] : memref<4x2x4x8x128xf32, #tpu.memory_space<vmem>>, vector<1x1x1x8x128xf32>
    %185 = vector.shape_cast %184 : vector<1x1x1x8x128xf32> to vector<8x128xf32>
    %186 = arith.mulf %149, %183 : vector<8x128xf32>
    %187 = arith.mulf %151, %185 : vector<8x128xf32>
    %188 = arith.subf %186, %187 : vector<8x128xf32>
    %189 = arith.mulf %149, %185 : vector<8x128xf32>
    %190 = arith.mulf %151, %183 : vector<8x128xf32>
    %191 = arith.addf %189, %190 : vector<8x128xf32>
    %192 = arith.addf %140, %158 : vector<8x128xf32>
    %193 = arith.addf %141, %161 : vector<8x128xf32>
    %194 = arith.addf %142, %168 : vector<8x128xf32>
    %195 = arith.addf %143, %171 : vector<8x128xf32>
    %196 = arith.addf %144, %178 : vector<8x128xf32>
    %197 = arith.addf %145, %181 : vector<8x128xf32>
    %198 = arith.addf %146, %188 : vector<8x128xf32>
    %199 = arith.addf %147, %191 : vector<8x128xf32>
    %c0_196 = arith.constant 0 : index
    %c0_197 = arith.constant 0 : index
    %c0_198 = arith.constant 0 : index
    %c0_199 = arith.constant 0 : index
    %c0_200 = arith.constant 0 : index
    %200 = vector.load %arg6[%c0_196, %c0_197, %c0_198, %c0_199, %c0_200] : memref<2x1x4x8x128xf32, #tpu.memory_space<vmem>>, vector<1x1x1x8x128xf32>
    %201 = vector.shape_cast %200 : vector<1x1x1x8x128xf32> to vector<8x128xf32>
    %202 = vector.shape_cast %192 : vector<8x128xf32> to vector<1x1x1x8x128xf32>
    tpu.vector_store %arg6[%c0_196, %c0_197, %c0_198, %c0_199, %c0_200], %202 {strides = array<i32>} : memref<2x1x4x8x128xf32, #tpu.memory_space<vmem>>, vector<1x1x1x8x128xf32>,
    %c1_201 = arith.constant 1 : index
    %c0_202 = arith.constant 0 : index
    %c0_203 = arith.constant 0 : index
    %c0_204 = arith.constant 0 : index
    %c0_205 = arith.constant 0 : index
    %203 = vector.load %arg6[%c1_201, %c0_202, %c0_203, %c0_204, %c0_205] : memref<2x1x4x8x128xf32, #tpu.memory_space<vmem>>, vector<1x1x1x8x128xf32>
    %204 = vector.shape_cast %203 : vector<1x1x1x8x128xf32> to vector<8x128xf32>
    %205 = vector.shape_cast %193 : vector<8x128xf32> to vector<1x1x1x8x128xf32>
    tpu.vector_store %arg6[%c1_201, %c0_202, %c0_203, %c0_204, %c0_205], %205 {strides = array<i32>} : memref<2x1x4x8x128xf32, #tpu.memory_space<vmem>>, vector<1x1x1x8x128xf32>,
    %c0_206 = arith.constant 0 : index
    %c0_207 = arith.constant 0 : index
    %c1_208 = arith.constant 1 : index
    %c0_209 = arith.constant 0 : index
    %c0_210 = arith.constant 0 : index
    %206 = vector.load %arg6[%c0_206, %c0_207, %c1_208, %c0_209, %c0_210] : memref<2x1x4x8x128xf32, #tpu.memory_space<vmem>>, vector<1x1x1x8x128xf32>
    %207 = vector.shape_cast %206 : vector<1x1x1x8x128xf32> to vector<8x128xf32>
    %208 = vector.shape_cast %194 : vector<8x128xf32> to vector<1x1x1x8x128xf32>
    tpu.vector_store %arg6[%c0_206, %c0_207, %c1_208, %c0_209, %c0_210], %208 {strides = array<i32>} : memref<2x1x4x8x128xf32, #tpu.memory_space<vmem>>, vector<1x1x1x8x128xf32>,
    %c1_211 = arith.constant 1 : index
    %c0_212 = arith.constant 0 : index
    %c1_213 = arith.constant 1 : index
    %c0_214 = arith.constant 0 : index
    %c0_215 = arith.constant 0 : index
    %209 = vector.load %arg6[%c1_211, %c0_212, %c1_213, %c0_214, %c0_215] : memref<2x1x4x8x128xf32, #tpu.memory_space<vmem>>, vector<1x1x1x8x128xf32>
    %210 = vector.shape_cast %209 : vector<1x1x1x8x128xf32> to vector<8x128xf32>
    %211 = vector.shape_cast %195 : vector<8x128xf32> to vector<1x1x1x8x128xf32>
    tpu.vector_store %arg6[%c1_211, %c0_212, %c1_213, %c0_214, %c0_215], %211 {strides = array<i32>} : memref<2x1x4x8x128xf32, #tpu.memory_space<vmem>>, vector<1x1x1x8x128xf32>,
    %c0_216 = arith.constant 0 : index
    %c0_217 = arith.constant 0 : index
    %c2_218 = arith.constant 2 : index
    %c0_219 = arith.constant 0 : index
    %c0_220 = arith.constant 0 : index
    %212 = vector.load %arg6[%c0_216, %c0_217, %c2_218, %c0_219, %c0_220] : memref<2x1x4x8x128xf32, #tpu.memory_space<vmem>>, vector<1x1x1x8x128xf32>
    %213 = vector.shape_cast %212 : vector<1x1x1x8x128xf32> to vector<8x128xf32>
    %214 = vector.shape_cast %196 : vector<8x128xf32> to vector<1x1x1x8x128xf32>
    tpu.vector_store %arg6[%c0_216, %c0_217, %c2_218, %c0_219, %c0_220], %214 {strides = array<i32>} : memref<2x1x4x8x128xf32, #tpu.memory_space<vmem>>, vector<1x1x1x8x128xf32>,
    %c1_221 = arith.constant 1 : index
    %c0_222 = arith.constant 0 : index
    %c2_223 = arith.constant 2 : index
    %c0_224 = arith.constant 0 : index
    %c0_225 = arith.constant 0 : index
    %215 = vector.load %arg6[%c1_221, %c0_222, %c2_223, %c0_224, %c0_225] : memref<2x1x4x8x128xf32, #tpu.memory_space<vmem>>, vector<1x1x1x8x128xf32>
    %216 = vector.shape_cast %215 : vector<1x1x1x8x128xf32> to vector<8x128xf32>
    %217 = vector.shape_cast %197 : vector<8x128xf32> to vector<1x1x1x8x128xf32>
    tpu.vector_store %arg6[%c1_221, %c0_222, %c2_223, %c0_224, %c0_225], %217 {strides = array<i32>} : memref<2x1x4x8x128xf32, #tpu.memory_space<vmem>>, vector<1x1x1x8x128xf32>,
    %c0_226 = arith.constant 0 : index
    %c0_227 = arith.constant 0 : index
    %c3_228 = arith.constant 3 : index
    %c0_229 = arith.constant 0 : index
    %c0_230 = arith.constant 0 : index
    %218 = vector.load %arg6[%c0_226, %c0_227, %c3_228, %c0_229, %c0_230] : memref<2x1x4x8x128xf32, #tpu.memory_space<vmem>>, vector<1x1x1x8x128xf32>
    %219 = vector.shape_cast %218 : vector<1x1x1x8x128xf32> to vector<8x128xf32>
    %220 = vector.shape_cast %198 : vector<8x128xf32> to vector<1x1x1x8x128xf32>
    tpu.vector_store %arg6[%c0_226, %c0_227, %c3_228, %c0_229, %c0_230], %220 {strides = array<i32>} : memref<2x1x4x8x128xf32, #tpu.memory_space<vmem>>, vector<1x1x1x8x128xf32>,
    %c1_231 = arith.constant 1 : index
    %c0_232 = arith.constant 0 : index
    %c3_233 = arith.constant 3 : index
    %c0_234 = arith.constant 0 : index
    %c0_235 = arith.constant 0 : index
    %221 = vector.load %arg6[%c1_231, %c0_232, %c3_233, %c0_234, %c0_235] : memref<2x1x4x8x128xf32, #tpu.memory_space<vmem>>, vector<1x1x1x8x128xf32>
    %222 = vector.shape_cast %221 : vector<1x1x1x8x128xf32> to vector<8x128xf32>
    %223 = vector.shape_cast %199 : vector<8x128xf32> to vector<1x1x1x8x128xf32>
    tpu.vector_store %arg6[%c1_231, %c0_232, %c3_233, %c0_234, %c0_235], %223 {strides = array<i32>} : memref<2x1x4x8x128xf32, #tpu.memory_space<vmem>>, vector<1x1x1x8x128xf32>,
    return
  }
  func.func @transform_0(%arg0: i32, %arg1: i32, %arg2: i32, %arg3: i32) -> (i32, i32, i32, i32, i32) {
    %c0_i32 = arith.constant 0 : i32
    %c0_i32_0 = arith.constant 0 : i32
    %c0_i32_1 = arith.constant 0 : i32
    return %arg0, %arg3, %c0_i32, %arg2, %c0_i32_0 : i32, i32, i32, i32, i32
  }
  func.func @transform_1(%arg0: i32, %arg1: i32, %arg2: i32, %arg3: i32) -> (i32, i32, i32, i32, i32) {
    %c0_i32 = arith.constant 0 : i32
    %c0_i32_0 = arith.constant 0 : i32
    %c0_i32_1 = arith.constant 0 : i32
    return %arg3, %c0_i32, %arg1, %arg2, %c0_i32_0 : i32, i32, i32, i32, i32
  }
  func.func @transform_2(%arg0: i32, %arg1: i32, %arg2: i32, %arg3: i32) -> (i32, i32, i32, i32, i32) {
    %c0_i32 = arith.constant 0 : i32
    %c0_i32_0 = arith.constant 0 : i32
    %c0_i32_1 = arith.constant 0 : i32
    return %c0_i32, %arg0, %arg1, %arg2, %c0_i32_0 : i32, i32, i32, i32, i32
  }
}

</mosaic_0001>

<bundles_post_ra>
// kernel: tpu_custom_call.1
= control target key start
LH: loop header
LB: loop body
LE: loop exit
PB: predicated region body
PF: predicated region fallthrough
CT: control target
= control target key end

     0   :  { %7 = vsyncpa [#allocation3], 0  ;;  %s1125_s0 = inlined_call_operand.hbm [shape: f32[2,4,2,8,128], index: 0, kind: input, shape index: {}]   ;;  %s1126_s1 = inlined_call_operand.hbm [shape: f32[4,2,4,8,128], index: 1, kind: input, shape index: {}]   ;;  %s1127_s2 = inlined_call_operand.hbm [shape: f32[2,2,4,8,128], index: 2, kind: output, shape index: {}]  }
   0x1   :  { %9 = vsyncpa [#allocation3 + $0x1], 0 }
   0x2   :  { %10 = vsyncpa [#allocation6], 0 }
   0x3   :  { %11 = vsyncpa [#allocation4], 0 }
   0x4   :  { %13 = vsyncpa [#allocation4 + $0x1], 0  ;;  %s871_s9 = smov 0   ;;  %s873_s10 = smov 0  }
   0x5   :  { %s875_s11 = smov 0   ;;  %s877_s12 = smov 0  }
   0x6   :  { %s879_s13 = smov 0   ;;  %s881_s14 = smov 0  }
   0x7 LB: > { %s605_s15 = sadd.s32 4294967295, %s844_s14   ;;  %s606_s16 = sadd.s32 4294967294, %s844_s14   ;;  %s844_s14 = sphi %s881_s14, %s19_s14   ;;  %s840_s13 = sphi %s879_s13, %s1139_s13   ;;  %s836_s12 = sphi %s877_s12, %s1138_s12   ;;  %s832_s11 = sphi %s875_s11, %s1137_s11   ;;  %s828_s10 = sphi %s873_s10, %s1136_s10   ;;  %s824_s9 = sphi %s871_s9, %s1135_s9  }
   0x8   : > { %p69_p0 = scmp.ne.s32.totalorder %s828_s10, %s824_s9  ;;  %p905_p1 = scmp.eq.s32.totalorder %s605_s15, 0 }
   0x9   : > { %p909_p2 = scmp.eq.s32.totalorder %s605_s15, 1  ;;  %p133_p3 = scmp.eq.s32.totalorder %s606_s16, 1 }
   0xa   : > { %p915_p4 = por %p905_p1, %p69_p0  ;;  %p607_p5 = scmp.ge.s32.totalorder %s844_s14, 1 }
   0xb   : > { %p920_p6 = por %p133_p3, %p69_p0  ;;  %p140_p7 = scmp.lt.s32.totalorder %s844_s14, 3 }
   0xc   : > { %s158_s23 = sshll.u32 %s1126_s1, 4  ;;  %s846_s25 = smov [#allocation5]   ;;  %s159_s23 = int_to_ptr.hbm [resolvable:$true] %s158_s23 }
   0xd   : > { %p928_p8 = pnand %p607_p5, %p140_p7  ;;  %s160_s26 = sshll.u32 %s846_s25, 4  ;;  %s161_s26 = int_to_ptr.vmem [resolvable:$true] %s160_s26 }
   0xe   : > { %p609_p11 = scmp.ge.s32.totalorder %s844_s14, 2  ;;  %s847_s27 = smov 128  }
   0xf   : > { %p652_p9 = pneg %p928_p8  ;;  %s848_s28 = smov 8  }
  0x10   : > { %s45_s29 = sadd.s32 1, %s840_s13  ;;  %s56_s30 = sadd.s32 1, %s832_s11 }
  0x11   : > { %p653_p10 = pnand %p652_p9, %p905_p1  ;;  %p47_p12 = scmp.ge.s32.totalorder %s45_s29, 2 }
  0x12   : > { %p63_p13 = scmp.ne.s32.totalorder %s832_s11, %s828_s10  ;;  %p64_p0 = scmp.eq.s32.totalorder %s844_s14, 0 }
  0x13   : > { %655 = dma.hbm_to_vmem [thread:$0]  (!%p653_p10), %s159_s23, 4096, %s161_s26, [#allocation6], %s847_s27, %s847_s27, %s848_s28  }
  0x14   : > { %s1141_s29 = smov (%p47_p12, %s45_s29), 0  ;;  %p947_p3 = por %p64_p0, %p63_p13 }
  0x15   : > { %p953_p5 = por %p909_p2, %p63_p13  ;;  %s49_s5 = ssub.s32 %s840_s13, %s1141_s29 }
  0x16   : > { %p665_p7 = scmp.lt.s32.totalorder %s844_s14, 2  ;;  %p54_p9 = scmp.eq.s32.totalorder %s49_s5, 0 }
  0x17   : > { %s174_s6 = sand.u32 1, %s832_s11   ;;  %s636_s15 = sshll.u32 %s840_s13, 6 }
  0x18   : > { %s610_s7 = sshll.u32 %s174_s6, 6  ;;  %s187_s22 = scalar_lea.hbm %s1125_s0, %s636_s15 }
  0x19   : > { %s962_s8 = scalar_select %p54_p9, %s832_s11, %s56_s30  }
  0x1a   : > { %s178_s23 = scalar_lea.vmem [#allocation2], %s610_s7  ;;  %s188_s18 = sshll.u32 %s187_s22, 4  ;;  %s189_s18 = int_to_ptr.hbm [resolvable:$true] %s188_s18 }
  0x1b   : > { %s190_s25 = sshll.u32 %s178_s23, 4  ;;  %p657_p2 = pnand %p665_p7, %p947_p3  ;;  %s191_s25 = int_to_ptr.vmem [resolvable:$true] %s190_s25 }
  0x1c   : > { %s175_s26 = scalar_lea.sflag [#allocation3], %s174_s6  ;;  %202 = sbr.rel (%p928_p8) target bundleno = 86 (0x56), region = 28 }
  0x1d   : > { %659 = dma.hbm_to_vmem [thread:$0]  (!%p657_p2), %s189_s18, 1024, %s191_s25, %s175_s26, %s847_s27, %s847_s27, %s848_s28  }
  0x1e   : > { %s976_s30 = sand.u32 (!%p928_p8), 1, %s828_s10  }
  0x1f   : > { %s614_s5 = sshll.u32 (!%p928_p8), %s976_s30, 6  ;;  %s205_s7 = scalar_lea.sflag (!%p928_p8), [#allocation3], %s976_s30 }
  0x20   : > { %s208_s3 = scalar_lea.vmem (!%p928_p8), [#allocation2], %s614_s5 }
  0x21   : > { %811 = dma.done.wait (%p915_p4), %s205_s7, 1024  }
  0x22   : > { %813 = vsyncadd (%p915_p4), %s205_s7, 4294966272 }
  0x23   : > { %815 = dma.done.wait (%p905_p1), [#allocation6], 4096  }
  0x24   : > { %817 = vsyncadd (%p905_p1), [#allocation6], 4294963200  ;;  %v990_v0 = vld [vmem:[%s208_s3] sm:$0xff]  ;;  %v992_v1 = vld [vmem:[%s208_s3 + $0x8] sm:$0xff]  ;;  %s1035_s17 = scalar_lea.vmem [#allocation7], %s614_s5  ;;  %s453_s19 = scalar_lea.sflag [#allocation4], %s976_s30 }
  0x25   : > { %v242_v2 = vld [vmem:[#allocation5] sm:$0xff]  ;;  %v995_v5 = vld [vmem:[%s208_s3 + $0x10] sm:$0xff]  ;;  %v997_v6 = vld [vmem:[%s208_s3 + $0x18] sm:$0xff] }
  0x26   : > { %v244_v3 = vld [vmem:[#allocation5 + $0x20] sm:$0xff]  ;;  %v245_v4 = vmul.f32 %v242_v2, %v990_v0  ;;  %v249_v7 = vmul.f32 %v992_v1, %v242_v2  ;;  %v1006_v15 = vld [vmem:[%s208_s3 + $0x28] sm:$0xff]  ;;  %v1012_v23 = vld [vmem:[%s208_s3 + $0x30] sm:$0xff] }
  0x27   : > { %v246_v8 = vmul.f32 %v992_v1, %v244_v3  ;;  %v286_v9 = vld [vmem:[#allocation5 + $0x40] sm:$0xff]  ;;  %v248_v12 = vmul.f32 %v244_v3, %v990_v0  ;;  %v1014_v24 = vld [vmem:[%s208_s3 + $0x38] sm:$0xff]  ;;  %v252_v32 = vld [vmem:[#allocation5 + $0x8] sm:$0xff] }
  0x28   : > { %v288_v10 = vld [vmem:[#allocation5 + $0x60] sm:$0xff]  ;;  %v289_v13 = vmul.f32 %v995_v5, %v286_v9  ;;  %v293_v19 = vmul.f32 %v997_v6, %v286_v9  ;;  %v254_v33 = vld [vmem:[#allocation5 + $0x28] sm:$0xff]  ;;  %v255_v44 = vmul.f32 %v252_v32, %v990_v0  ;;  %v264_v9 = vld [vmem:[#allocation5 + $0x30] sm:$0xff] }
  0x29   : > { %v1001_v11 = vld [vmem:[%s208_s3 + $0x20] sm:$0xff]  ;;  %v290_v14 = vmul.f32 %v997_v6, %v288_v10  ;;  %v292_v18 = vmul.f32 %v995_v5, %v288_v10  ;;  %v247_v20 = vsub.f32 %v245_v4, %v246_v8  ;;  %v250_v26 = vadd.f32 %v249_v7, %v248_v12  ;;  %v296_v38 = vld [vmem:[#allocation5 + $0x48] sm:$0xff]  ;;  %v262_v8 = vld [vmem:[#allocation5 + $0x10] sm:$0xff] }
  0x2a   : > { %v338_v16 = vld [vmem:[#allocation5 + $0x80] sm:$0xff]  ;;  %v298_v39 = vld [vmem:[#allocation5 + $0x68] sm:$0xff]  ;;  %v256_v49 = vmul.f32 %v992_v1, %v254_v33  ;;  %v299_v50 = vmul.f32 %v995_v5, %v296_v38  ;;  %v258_v63 = vmul.f32 %v254_v33, %v990_v0  ;;  %v259_v4 = vmul.f32 %v992_v1, %v252_v32 }
  0x2b   : > { %v340_v17 = vld [vmem:[#allocation5 + $0xa0] sm:$0xff]  ;;  %v341_v21 = vmul.f32 %v1001_v11, %v338_v16  ;;  %v291_v27 = vsub.f32 %v289_v13, %v290_v14  ;;  %v294_v30 = vadd.f32 %v293_v19, %v292_v18  ;;  %v345_v36 = vmul.f32 %v1006_v15, %v338_v16  ;;  %v348_v40 = vld [vmem:[#allocation5 + $0x88] sm:$0xff]  ;;  %v306_v16 = vld [vmem:[#allocation5 + $0x50] sm:$0xff] }
  0x2c   : > { %v342_v22 = vmul.f32 %v1006_v15, %v340_v17  ;;  %v390_v25 = vld [vmem:[#allocation5 + $0xc0] sm:$0xff]  ;;  %v344_v31 = vmul.f32 %v1001_v11, %v340_v17  ;;  %v350_v45 = vld [vmem:[#allocation5 + $0xa8] sm:$0xff]  ;;  %v300_v54 = vmul.f32 %v997_v6, %v298_v39  ;;  %v351_v55 = vmul.f32 %v1001_v11, %v348_v40  ;;  %v308_v17 = vld [vmem:[#allocation5 + $0x70] sm:$0xff] }
  0x2d   : > { %v392_v28 = vld [vmem:[#allocation5 + $0xe0] sm:$0xff]  ;;  %v393_v29 = vmul.f32 %v1012_v23, %v390_v25  ;;  %v325_v41 = vadd.f32 %v291_v27, %v247_v20  ;;  %v326_v42 = vadd.f32 %v294_v30, %v250_v26  ;;  %v397_v43 = vmul.f32 %v1014_v24, %v390_v25  ;;  %v400_v46 = vld [vmem:[#allocation5 + $0xc8] sm:$0xff]  ;;  %v410_v30 = vld [vmem:[#allocation5 + $0xd0] sm:$0xff] }
  0x2e   : > { %v343_v34 = vsub.f32 %v341_v21, %v342_v22  ;;  %v394_v35 = vmul.f32 %v1014_v24, %v392_v28  ;;  %v396_v37 = vmul.f32 %v1012_v23, %v392_v28  ;;  %v346_v48 = vadd.f32 %v345_v36, %v344_v31  ;;  %v402_v51 = vld [vmem:[#allocation5 + $0xe8] sm:$0xff]  ;;  %v358_v22 = vld [vmem:[#allocation5 + $0x90] sm:$0xff] }
  0x2f   : > { %v257_v57 = vsub.f32 %v255_v44, %v256_v49  ;;  %v352_v58 = vmul.f32 %v1006_v15, %v350_v45  ;;  %v403_v59 = vmul.f32 %v1012_v23, %v400_v46  ;;  %v301_v61 = vsub.f32 %v299_v50, %v300_v54  ;;  %v412_v31 = vld [vmem:[#allocation5 + $0xf0] sm:$0xff]  ;;  %v316_v54 = vld [vmem:[#allocation5 + $0x58] sm:$0xff] }
  0x30   : > { %v395_v47 = vsub.f32 %v393_v29, %v394_v35  ;;  %v377_v52 = vadd.f32 %v343_v34, %v325_v41  ;;  %v398_v53 = vadd.f32 %v397_v43, %v396_v37  ;;  %v378_v56 = vadd.f32 %v346_v48, %v326_v42  ;;  %v360_v29 = vld [vmem:[#allocation5 + $0xb0] sm:$0xff] }
  0x31   : > { %v404_v62 = vmul.f32 %v1014_v24, %v402_v51  ;;  %v353_v3 = vsub.f32 %v351_v55, %v352_v58  ;;  %v302_v7 = vmul.f32 %v995_v5, %v298_v39  ;;  %v327_v10 = vadd.f32 %v301_v61, %v257_v57 }
  0x32   : > { %v429_v60 = vadd.f32 %v395_v47, %v377_v52  ;;  %v430_v2 = vadd.f32 %v398_v53, %v378_v56  ;;  %v303_v13 = vmul.f32 %v997_v6, %v296_v38  ;;  %v354_v14 = vmul.f32 %v1001_v11, %v350_v45  ;;  %v272_v52 = vld [vmem:[#allocation5 + $0x18] sm:$0xff] }
  0x33   : > { %v405_v12 = vsub.f32 %v403_v59, %v404_v62  ;;  %v260_v18 = vadd.f32 %v259_v4, %v258_v63  ;;  %v355_v19 = vmul.f32 %v1006_v15, %v348_v40  ;;  %v406_v20 = vmul.f32 %v1012_v23, %v402_v51  ;;  %v274_v53 = vld [vmem:[#allocation5 + $0x38] sm:$0xff] }
  0x34   : > { %437 = vst [vmem:[%s1035_s17] sm:$0xff] %v429_v60  ;;  %v407_v21 = vmul.f32 %v1014_v24, %v400_v46  ;;  %v379_v25 = vadd.f32 %v353_v3, %v327_v10  ;;  %v304_v26 = vadd.f32 %v303_v13, %v302_v7  ;;  %v265_v27 = vmul.f32 %v262_v8, %v990_v0  ;;  %v318_v59 = vld [vmem:[#allocation5 + $0x78] sm:$0xff] }
  0x35   : > { %624 = vst [vmem:[%s1035_s17 + $0x20] sm:$0xff] %v430_v2  ;;  %v266_v28 = vmul.f32 %v992_v1, %v264_v9  ;;  %v356_v32 = vadd.f32 %v355_v19, %v354_v14  ;;  %v309_v34 = vmul.f32 %v995_v5, %v306_v16  ;;  %v310_v35 = vmul.f32 %v997_v6, %v308_v17  ;;  %v368_v2 = vld [vmem:[#allocation5 + $0x98] sm:$0xff] }
  0x36   : > { %v408_v33 = vadd.f32 %v407_v21, %v406_v20  ;;  %v431_v36 = vadd.f32 %v405_v12, %v379_v25  ;;  %v328_v37 = vadd.f32 %v304_v26, %v260_v18  ;;  %v361_v39 = vmul.f32 %v1001_v11, %v358_v22  ;;  %v370_v3 = vld [vmem:[#allocation5 + $0xb8] sm:$0xff] }
  0x37   : > { %v267_v38 = vsub.f32 %v265_v27, %v266_v28  ;;  %v311_v40 = vsub.f32 %v309_v34, %v310_v35  ;;  %v362_v41 = vmul.f32 %v1006_v15, %v360_v29  ;;  %v413_v42 = vmul.f32 %v1012_v23, %v410_v30  ;;  %v420_v4 = vld [vmem:[#allocation5 + $0xd8] sm:$0xff] }
  0x38   : > { %v414_v43 = vmul.f32 %v1014_v24, %v412_v31  ;;  %625 = vst [vmem:[%s1035_s17 + $0x8] sm:$0xff] %v431_v36  ;;  %v380_v44 = vadd.f32 %v356_v32, %v328_v37  ;;  %v268_v45 = vmul.f32 %v264_v9, %v990_v0  ;;  %v269_v46 = vmul.f32 %v992_v1, %v262_v8  ;;  %v422_v12 = vld [vmem:[#allocation5 + $0xf8] sm:$0xff] }
  0x39   : > { %v312_v47 = vmul.f32 %v995_v5, %v308_v17  ;;  %v329_v48 = vadd.f32 %v311_v40, %v267_v38  ;;  %v363_v49 = vsub.f32 %v361_v39, %v362_v41  ;;  %v313_v51 = vmul.f32 %v997_v6, %v306_v16 }
  0x3a   : > { %v415_v50 = vsub.f32 %v413_v42, %v414_v43  ;;  %v432_v55 = vadd.f32 %v408_v33, %v380_v44  ;;  %v270_v56 = vadd.f32 %v269_v46, %v268_v45  ;;  %v364_v57 = vmul.f32 %v1001_v11, %v360_v29 }
  0x3b   : > { %v365_v58 = vmul.f32 %v1006_v15, %v358_v22  ;;  %v381_v60 = vadd.f32 %v363_v49, %v329_v48  ;;  %v314_v61 = vadd.f32 %v313_v51, %v312_v47  ;;  %v416_v62 = vmul.f32 %v1012_v23, %v412_v31 }
  0x3c   : > { %v417_v63 = vmul.f32 %v1014_v24, %v410_v30  ;;  %626 = vst [vmem:[%s1035_s17 + $0x28] sm:$0xff] %v432_v55  ;;  %v275_v8 = vmul.f32 %v272_v52, %v990_v0  ;;  %v276_v9 = vmul.f32 %v992_v1, %v274_v53  ;;  %v319_v10 = vmul.f32 %v995_v5, %v316_v54 }
  0x3d   : > { %v366_v7 = vadd.f32 %v365_v58, %v364_v57  ;;  %v433_v13 = vadd.f32 %v415_v50, %v381_v60  ;;  %v330_v14 = vadd.f32 %v314_v61, %v270_v56  ;;  %v320_v17 = vmul.f32 %v997_v6, %v318_v59 }
  0x3e   : > { %v418_v16 = vadd.f32 %v417_v63, %v416_v62  ;;  %v277_v18 = vsub.f32 %v275_v8, %v276_v9  ;;  %v371_v19 = vmul.f32 %v1001_v11, %v368_v2  ;;  %v372_v20 = vmul.f32 %v1006_v15, %v370_v3 }
  0x3f   : > { %v423_v21 = vmul.f32 %v1012_v23, %v420_v4  ;;  %627 = vst [vmem:[%s1035_s17 + $0x10] sm:$0xff] %v433_v13  ;;  %v382_v22 = vadd.f32 %v366_v7, %v330_v14  ;;  %v321_v25 = vsub.f32 %v319_v10, %v320_v17  ;;  %v424_v26 = vmul.f32 %v1014_v24, %v422_v12 }
  0x40   : > { %v278_v27 = vmul.f32 %v274_v53, %v990_v0  ;;  %v373_v28 = vsub.f32 %v371_v19, %v372_v20  ;;  %v279_v29 = vmul.f32 %v992_v1, %v272_v52  ;;  %v322_v30 = vmul.f32 %v995_v5, %v318_v59 }
  0x41   : > { %v323_v31 = vmul.f32 %v997_v6, %v316_v54  ;;  %v434_v32 = vadd.f32 %v418_v16, %v382_v22  ;;  %v331_v33 = vadd.f32 %v321_v25, %v277_v18  ;;  %v425_v34 = vsub.f32 %v423_v21, %v424_v26 }
  0x42   : > { %v374_v35 = vmul.f32 %v1001_v11, %v370_v3  ;;  %v280_v36 = vadd.f32 %v279_v29, %v278_v27  ;;  %v375_v38 = vmul.f32 %v1006_v15, %v368_v2  ;;  %v426_v0 = vmul.f32 %v1012_v23, %v422_v12 }
  0x43   : > { %v324_v37 = vadd.f32 %v323_v31, %v322_v30  ;;  %628 = vst [vmem:[%s1035_s17 + $0x30] sm:$0xff] %v434_v32  ;;  %v383_v1 = vadd.f32 %v373_v28, %v331_v33  ;;  %v427_v5 = vmul.f32 %v1014_v24, %v420_v4 }
  0x44   : > { %v376_v6 = vadd.f32 %v375_v38, %v374_v35 }
  0x45   : > { %v332_v39 = vadd.f32 %v324_v37, %v280_v36  ;;  %v435_v40 = vadd.f32 %v425_v34, %v383_v1  ;;  %v428_v41 = vadd.f32 %v427_v5, %v426_v0 }
  0x47   : > { %v384_v42 = vadd.f32 %v376_v6, %v332_v39  ;;  %629 = vst [vmem:[%s1035_s17 + $0x18] sm:$0xff] %v435_v40 }
  0x49   : > { %v436_v43 = vadd.f32 %v428_v41, %v384_v42 }
  0x4b   : > { %630 = vst [vmem:[%s1035_s17 + $0x38] sm:$0xff] %v436_v43 }
  0x4c   : > { %s637_s24 = sshll.u32 %s836_s12, 5  ;;  %s478_s27 = sshll.u32 %s1035_s17, 4  ;;  %s479_s27 = int_to_ptr.vmem [resolvable:$true] %s478_s27 }
  0x4d   : > { %s467_s15 = scalar_lea.hbm %s1127_s2, %s637_s24  ;;  %s849_s21 = smov 512  }
  0x4e   : > { %s480_s16 = sshll.u32 %s467_s15, 4  ;;  %644 = sst [smem:[#allocation9]] (%p953_p5), %s849_s21  ;;  %s481_s16 = int_to_ptr.hbm [resolvable:$true] %s480_s16 }
  0x4f   : > { %s850_s22 = smov 1024   ;;  %s851_s23 = smov 4  }
  0x50   : > { %645 = sst [smem:[#allocation9 + $0x1]] (%p953_p5), %s850_s22  ;;  %s852_s12 = smov 128  }
  0x51   : > { %646 = sst [smem:[#allocation9 + $0x2]] (%p953_p5), %s851_s23  ;;  %s853_s25 = smov 8  }
  0x52   : > { %647 = sst [smem:[#allocation9 + $0x3]] (%p953_p5), %s852_s12  ;;  %s854_s18 = smov [#allocation8]  }
  0x53   : > { %648 = sst [smem:[#allocation9 + $0x4]] (%p953_p5), %s852_s12  ;;  %s855_s26 = smov 0  }
  0x54   : > { %649 = sst [smem:[#allocation9 + $0x5]] (%p953_p5), %s853_s25 }
  0x55   : > { %650 = dma.general (%p953_p5), %s479_s27, 1024, %s481_s16, %s453_s19, %s854_s18, [#allocation9], %s855_s26, 0  }
  0x56 PF: > { %s508_s30 = sand.u32 1, %s824_s9   ;;  %p661_p1 = pnand %p609_p11, %p920_p6 }
  0x57   : > { %s509_s5 = scalar_lea.sflag [#allocation4], %s508_s30 }
  0x58   : > { %p662_p4 = pneg %p661_p1 }
  0x5a   : > { %819 = dma.done.wait (%p662_p4), %s509_s5, 1024  }
  0x5b   : > { %821 = vsyncadd (%p662_p4), %s509_s5, 4294966272  ;;  %s19_s14 = sadd.s32 1, %s844_s14   ;;  %s1135_s9 = smov %s828_s10 }
  0x5c   : > { %p16_p8 = scmp.ge.s32.totalorder %s19_s14, 4   ;;  %s1136_s10 = smov %s832_s11 }
  0x5d   : > { %s1137_s11 = smov %s962_s8  ;;  %s1138_s12 = smov %s840_s13 }
  0x5e   : > { %s1139_s13 = smov %s1141_s29  ;;  %18 = sbr.rel (!%p16_p8) target bundleno = 7 (0x7), region = 128 }
  0x63   :  { %515 = vsyncpa [#allocation3], 1 }
  0x64   :  { %517 = vsyncpa [#allocation3 + $0x1], 1 }
  0x65   :  { %518 = vsyncpa [#allocation6], 1 }
  0x66   :  { %519 = vsyncpa [#allocation4], 1 }
  0x67   :  { %521 = vsyncpa [#allocation4 + $0x1], 1 }

</bundles_post_ra>
